<compile_context>
chip_gen: v6e
topology: v6e:2x2x1
jax: 0.10.0
libtpu: 0.0.40
codegen_flags: <defaults>
</compile_context>

<pallas_src>
import functools

import jax
import jax.numpy as jnp
from jax.experimental import pallas as pl
from jax.experimental.pallas import tpu as pltpu

_LANE = 128
_MIN_CONTRACT = 8


def _round_up(v, m):
    return -(-v // m) * m


# ----------------------------- graph construction (host-side glue, plain JAX) --------

def build_indexing(h, w):
    """Exact port of the PyTorch build_indexing (uses h as row stride and 4 for targets)."""
    i, j = jnp.meshgrid(jnp.arange(h, dtype=jnp.int32),
                        jnp.arange(w, dtype=jnp.int32), indexing="ij")
    i, j = i.flatten(), j.flatten()
    row = jnp.concatenate((
        (i - 1) % h * h + (j - 1) % w,
        (i - 1) % h * h + j % w,
        (i - 1) % h * h + (j + 1) % w,
        i % h * h + (j - 1) % w,
        i % h * h + j % w,
        i % h * h + (j + 1) % w,
        (i - 1) % h * h + (j - 1) % w,
        (i - 1) % h * h + j % w,
        (i - 1) % h * h + (j + 1) % w,
    ))
    col = jnp.broadcast_to((i * 4 + j)[:, None], (i.shape[0], 9)).flatten()
    return jnp.stack((row, col))


def normalized_adjacency(edge_index, num_nodes):
    """Dense A_hat with PyG GCNConv gcn_norm semantics (add_self_loops=True)."""
    row, col = edge_index[0], edge_index[1]
    # add_remaining_self_loops: drop existing self loops (weight -> 0), add fresh ones.
    w_e = jnp.where(row == col, 0.0, 1.0).astype(jnp.float32)
    loop = jnp.arange(num_nodes, dtype=edge_index.dtype)
    row = jnp.concatenate([row, loop])
    col = jnp.concatenate([col, loop])
    w_e = jnp.concatenate([w_e, jnp.ones((num_nodes,), jnp.float32)])
    deg = jnp.zeros((num_nodes,), jnp.float32).at[col].add(w_e)
    dis = jnp.where(deg > 0, 1.0 / jnp.sqrt(deg), 0.0)
    norm = dis[row] * w_e * dis[col]
    # out[col] += norm * x[row]  =>  A_hat[col, row] += norm
    return jnp.zeros((num_nodes, num_nodes), jnp.float32).at[col, row].add(norm)


# ----------------------------- Pallas kernel: fused multi-layer GCN ------------------

def fused_gcn_kernel(*refs, layer_plan, batch, out_pad_lanes):
    """refs = (a_ref, x_ref, w0_ref, b0_ref, w1_ref, b1_ref, ..., o_ref).

    a_ref : (N, N)              shared normalized adjacency (compute dtype, bf16 default)
    x_ref : (N, B*Fin0)         node features, batch packed along the lane axis
    w_ref : (Fin, Fout)         SHARED layer weight (compute dtype) -- no block-diagonal
    b_ref : (1, B*Fout)         lane-tiled bias (f32)
    o_ref : (N, out_pad_lanes)  lane-dense (multiple of 128) f32 output

    All layers run in one invocation; the hidden activation never leaves VMEM/vregs.
    Every dot accumulates in f32 (preferred_element_type); bias + ReLU run on the f32
    accumulator before re-casting to the MXU compute dtype for the next layer.
    """
    a_ref, x_ref, o_ref = refs[0], refs[1], refs[-1]
    wb_refs = refs[2:-1]
    a = a_ref[...]                        # (N, N) compute dtype
    h = x_ref[...]                        # (N, B*Fin0) compute dtype
    n_layers = len(layer_plan)
    for li, (fin, fout, aggregate_first, apply_relu) in enumerate(layer_plan):
        w = wb_refs[2 * li][...]          # (fin, fout) shared weight
        b = wb_refs[2 * li + 1][...]      # (1, B*fout) f32 bias
        if aggregate_first:
            # (A @ H) @ W : one batched aggregation, then per-batch feature transform.
            # Cheaper when the input width is the narrower one.
            t = jnp.dot(a, h, preferred_element_type=jnp.float32).astype(w.dtype)
            y = jnp.concatenate(
                [jnp.dot(t[:, bi * fin:(bi + 1) * fin], w,
                         preferred_element_type=jnp.float32)
                 for bi in range(batch)], axis=-1)
        else:
            # A @ (H @ W) : per-batch transform first (narrower lanes), one aggregation.
            t = jnp.concatenate(
                [jnp.dot(h[:, bi * fin:(bi + 1) * fin], w,
                         preferred_element_type=jnp.float32)
                 for bi in range(batch)], axis=-1).astype(a.dtype)
            y = jnp.dot(a, t, preferred_element_type=jnp.float32)
        y = y + b                          # f32 epilogue (bias after aggregation, PyG)
        if apply_relu:
            y = jnp.maximum(y, 0.0)        # f32 ReLU (no bf16 VPU dependence on v5e)
        # TODO(synk): nn.Dropout is identity here (eval-mode forward).
        h = y.astype(a.dtype) if li < n_layers - 1 else y
    # Lane-dense store: pad to a multiple of 128 lanes so the writeback is unmasked.
    pad = out_pad_lanes - h.shape[-1]
    if pad:
        h = jnp.concatenate([h, jnp.zeros((h.shape[0], pad), h.dtype)], axis=-1)
    o_ref[...] = h.astype(o_ref.dtype)


# ----------------------------- one-time prepare + jitted forward ---------------------

def make_gnn_forward(params, *, batch, h, w, dim, compute_dtype=jnp.bfloat16):
    """Precompute the graph + packed params ONCE and return a jitted forward(x).

    Hoists build_indexing / normalized_adjacency / weight packing out of the per-call
    path (at these shapes the host-side graph build dominated wall-clock when re-done
    each call).  The per-call path is just the lane packing of x and one fused
    pallas_call.
    """
    n_nodes = (h * w * dim) // 4
    c_in = params[0][0].shape[0]
    c_out = params[-1][0].shape[1]
    assert c_in == 4, "GNNModel views the input as (B, N, 4) node features"
    n_layers = len(params)

    a_hat = normalized_adjacency(build_indexing(h, w), n_nodes).astype(compute_dtype)

    # Per-layer params: SHARED (Fin, Fout) weights (no block-diagonal), lane-tiled f32
    # biases.  Layer-0 Fin is zero-padded so every MXU contraction depth is >= 8.
    fin0_pad = _round_up(max(c_in, _MIN_CONTRACT), _MIN_CONTRACT)
    packed, plan = [], []
    for li, (wmat, bias) in enumerate(params):
        fin, fout = wmat.shape
        if li == 0 and fin0_pad != fin:
            wmat = jnp.concatenate(
                [wmat, jnp.zeros((fin0_pad - fin, fout), wmat.dtype)], axis=0)
            fin = fin0_pad
        packed += [wmat.astype(compute_dtype),
                   jnp.tile(bias.reshape(1, fout).astype(jnp.float32), (1, batch))]
        # Contract A_hat against the narrower packed side (pure FLOP reduction; the two
        # associations differ slightly under bf16, both accumulate in f32).
        plan.append((fin, fout, fin <= fout, li < n_layers - 1))
    plan = tuple(plan)

    out_lanes = batch * c_out
    out_pad = _round_up(max(out_lanes, _LANE), _LANE)

    # Advisory cost estimate + explicit VMEM budget for the grid-less resident design.
    cbytes = jnp.dtype(compute_dtype).itemsize
    flops = 0
    for fin, fout, agg_first, _ in plan:
        flops += 2 * n_nodes * n_nodes * batch * (fin if agg_first else fout)  # A_hat term
        flops += 2 * batch * n_nodes * fin * fout                              # X @ W term
    bytes_accessed = (a_hat.size * cbytes
                      + n_nodes * batch * fin0_pad * cbytes
                      + sum(p.size * p.dtype.itemsize for p in packed)
                      + n_nodes * out_pad * 4)
    max_width = max(max(batch * fout for _, fout, _, _ in plan), out_pad)
    working_set = bytes_accessed + 2 * n_nodes * max_width * 4
    vmem_limit = int(min(64 * 2 ** 20, max(16 * 2 ** 20, 2 * working_set)))

    kernel = functools.partial(fused_gcn_kernel, layer_plan=plan, batch=batch,
                               out_pad_lanes=out_pad)
    n_inputs = 2 + len(packed)
    gcn_call = pl.pallas_call(
        kernel,
        out_shape=jax.ShapeDtypeStruct((n_nodes, out_pad), jnp.float32),
        # Grid-less call: single invocation, every operand resident in VMEM, loaded once.
        # TODO(synk): for large N switch to a parallel row-band grid over A_hat
        # (BlockSpec((TM, N), ...), dimension_semantics=("parallel",)) + sparse aggregation.
        in_specs=[pl.BlockSpec(memory_space=pltpu.MemorySpace.VMEM)
                  for _ in range(n_inputs)],
        out_specs=pl.BlockSpec(memory_space=pltpu.MemorySpace.VMEM),
        compiler_params=pltpu.CompilerParams(vmem_limit_bytes=vmem_limit),
        cost_estimate=pl.CostEstimate(flops=int(flops), transcendentals=0,
                                      bytes_accessed=int(bytes_accessed)),
    )

    def forward(x):
        # Batch packed into the lane axis: xp[n, b*fin0_pad + f] = x.view(B, N, 4)[b, n, f].
        feats = jnp.transpose(x.reshape(batch, n_nodes, c_in), (1, 0, 2))  # (N, B, 4)
        if fin0_pad != c_in:
            feats = jnp.pad(feats, ((0, 0), (0, 0), (0, fin0_pad - c_in)))
        xp = feats.reshape(n_nodes, batch * fin0_pad).astype(compute_dtype)
        out = gcn_call(a_hat, xp, *packed)
        out = out[:, :out_lanes].reshape(n_nodes, batch, c_out)
        return jnp.transpose(out, (1, 0, 2))

    return jax.jit(forward)


# ----------------------------- params + plain-JAX reference --------------------------

def init_params(key, c_in, c_hidden, c_out, num_layers=2):
    """Deterministic glorot-uniform weights (stored as (in, out)), zero biases."""
    dims = [c_in] + [c_hidden] * (num_layers - 1) + [c_out]
    params = []
    for li in range(num_layers):
        fan_in, fan_out = dims[li], dims[li + 1]
        key, sub = jax.random.split(key)
        limit = jnp.sqrt(6.0 / (fan_in + fan_out))
        wmat = jax.random.uniform(sub, (fan_in, fan_out), jnp.float32, -limit, limit)
        bias = jnp.zeros((1, fan_out), jnp.float32)
        params.append((wmat, bias))
    return params


def gnn_forward_ref(x, params):
    """Pure f32 JAX reference (dense A_hat, per-batch GCN layers)."""
    B, h, w, dim = x.shape
    N = (h * w * dim) // 4
    a_hat = normalized_adjacency(build_indexing(h, w), N)
    feats = x.reshape(B, N, 4)
    for li, (W, b) in enumerate(params):
        y = jnp.einsum("nm,bmf->bnf", a_hat, feats @ W) + b[None]
        feats = jnp.maximum(y, 0.0) if li < len(params) - 1 else y
    return feats


if __name__ == "__main__":
    key = jax.random.PRNGKey(0)
    kx, kp = jax.random.split(key)

    # Self-consistent shapes (the build_indexing `*4` target quirk needs h=w=4, dim=4):
    # B=2, h=w=4, dim=4 -> N=16 nodes, 4 features per node.
    B, H, W, DIM = 2, 4, 4, 4
    C_IN, C_HIDDEN, C_OUT = 4, 32, 8

    x = jax.random.normal(kx, (B, H, W, DIM), jnp.float32)
    params = init_params(kp, C_IN, C_HIDDEN, C_OUT, num_layers=2)
    ref = gnn_forward_ref(x, params)

    # f32 compute path: tight structural correctness check of the fused kernel.
    fwd_f32 = make_gnn_forward(params, batch=B, h=H, w=W, dim=DIM,
                               compute_dtype=jnp.float32)
    out_f32 = jax.block_until_ready(fwd_f32(x))
    assert out_f32.shape == (B, H * W, C_OUT)
    assert jnp.allclose(out_f32, ref, atol=1e-4, rtol=1e-4)

    # Default perf path: bf16 MXU inputs, f32 accumulation/epilogue (looser tolerance).
    fwd = make_gnn_forward(params, batch=B, h=H, w=W, dim=DIM)
    out = jax.block_until_ready(fwd(x))
    assert out.shape == (B, H * W, C_OUT)
    assert jnp.allclose(out, ref, atol=5e-2, rtol=5e-2)

    print("KERNEL_OK")
</pallas_src>

<mosaic_0001>
module attributes {stable_mosaic.version = 11 : i64} {
  func.func @fused_gcn_kernel(%arg0: memref<16x16xf32, #tpu.memory_space<vmem>>, %arg1: memref<16x16xf32, #tpu.memory_space<vmem>>, %arg2: memref<8x32xf32, #tpu.memory_space<vmem>>, %arg3: memref<1x64xf32, #tpu.memory_space<vmem>>, %arg4: memref<32x8xf32, #tpu.memory_space<vmem>>, %arg5: memref<1x16xf32, #tpu.memory_space<vmem>>, %arg6: memref<16x128xf32, #tpu.memory_space<vmem>>) attributes {dimension_semantics = [], scalar_prefetch = 0 : i64, scratch_operands = 0 : i64, tpu.core_type = #tpu.core_type<tc>} {
    %c0 = arith.constant 0 : index
    %c0_0 = arith.constant 0 : index
    %0 = vector.load %arg0[%c0, %c0_0] : memref<16x16xf32, #tpu.memory_space<vmem>>, vector<16x16xf32>
    %c0_1 = arith.constant 0 : index
    %c0_2 = arith.constant 0 : index
    %1 = vector.load %arg1[%c0_1, %c0_2] : memref<16x16xf32, #tpu.memory_space<vmem>>, vector<16x16xf32>
    %c0_3 = arith.constant 0 : index
    %c0_4 = arith.constant 0 : index
    %2 = vector.load %arg2[%c0_3, %c0_4] : memref<8x32xf32, #tpu.memory_space<vmem>>, vector<8x32xf32>
    %c0_5 = arith.constant 0 : index
    %c0_6 = arith.constant 0 : index
    %3 = vector.load %arg3[%c0_5, %c0_6] : memref<1x64xf32, #tpu.memory_space<vmem>>, vector<1x64xf32>
    %cst = arith.constant dense<0.000000e+00> : vector<16x16xf32>
    %4 = tpu.matmul %0, %1, %cst {dimension_numbers = #tpu.dot_dimension_numbers<[1], [0], [0], [1], [0, 0, 1, 1], [], []>} : vector<16x16xf32>, vector<16x16xf32>, vector<16x16xf32> -> vector<16x16xf32>
    %5 = vector.extract_strided_slice %4 {offsets = [0, 0], sizes = [16, 8], strides = [1, 1]} : vector<16x16xf32> to vector<16x8xf32>
    %cst_7 = arith.constant dense<0.000000e+00> : vector<16x32xf32>
    %6 = tpu.matmul %5, %2, %cst_7 {dimension_numbers = #tpu.dot_dimension_numbers<[1], [0], [0], [1], [0, 0, 1, 1], [], []>} : vector<16x8xf32>, vector<8x32xf32>, vector<16x32xf32> -> vector<16x32xf32>
    %7 = vector.extract_strided_slice %4 {offsets = [0, 8], sizes = [16, 8], strides = [1, 1]} : vector<16x16xf32> to vector<16x8xf32>
    %cst_8 = arith.constant dense<0.000000e+00> : vector<16x32xf32>
    %8 = tpu.matmul %7, %2, %cst_8 {dimension_numbers = #tpu.dot_dimension_numbers<[1], [0], [0], [1], [0, 0, 1, 1], [], []>} : vector<16x8xf32>, vector<8x32xf32>, vector<16x32xf32> -> vector<16x32xf32>
    %9 = tpu.concatenate %6, %8 in 1 : vector<16x32xf32>, vector<16x32xf32> -> vector<16x64xf32>
    %10 = vector.broadcast %3 : vector<1x64xf32> to vector<16x64xf32>
    %11 = arith.addf %9, %10 : vector<16x64xf32>
    %cst_9 = arith.constant 0.000000e+00 : f32
    %12 = vector.broadcast %cst_9 : f32 to vector<16x64xf32>
    %13 = arith.maximumf %11, %12 : vector<16x64xf32>
    %c0_10 = arith.constant 0 : index
    %c0_11 = arith.constant 0 : index
    %14 = vector.load %arg4[%c0_10, %c0_11] : memref<32x8xf32, #tpu.memory_space<vmem>>, vector<32x8xf32>
    %c0_12 = arith.constant 0 : index
    %c0_13 = arith.constant 0 : index
    %15 = vector.load %arg5[%c0_12, %c0_13] : memref<1x16xf32, #tpu.memory_space<vmem>>, vector<1x16xf32>
    %16 = vector.extract_strided_slice %13 {offsets = [0, 0], sizes = [16, 32], strides = [1, 1]} : vector<16x64xf32> to vector<16x32xf32>
    %cst_14 = arith.constant dense<0.000000e+00> : vector<16x8xf32>
    %17 = tpu.matmul %16, %14, %cst_14 {dimension_numbers = #tpu.dot_dimension_numbers<[1], [0], [0], [1], [0, 0, 1, 1], [], []>} : vector<16x32xf32>, vector<32x8xf32>, vector<16x8xf32> -> vector<16x8xf32>
    %18 = vector.extract_strided_slice %13 {offsets = [0, 32], sizes = [16, 32], strides = [1, 1]} : vector<16x64xf32> to vector<16x32xf32>
    %cst_15 = arith.constant dense<0.000000e+00> : vector<16x8xf32>
    %19 = tpu.matmul %18, %14, %cst_15 {dimension_numbers = #tpu.dot_dimension_numbers<[1], [0], [0], [1], [0, 0, 1, 1], [], []>} : vector<16x32xf32>, vector<32x8xf32>, vector<16x8xf32> -> vector<16x8xf32>
    %20 = tpu.concatenate %17, %19 in 1 : vector<16x8xf32>, vector<16x8xf32> -> vector<16x16xf32>
    %cst_16 = arith.constant dense<0.000000e+00> : vector<16x16xf32>
    %21 = tpu.matmul %0, %20, %cst_16 {dimension_numbers = #tpu.dot_dimension_numbers<[1], [0], [0], [1], [0, 0, 1, 1], [], []>} : vector<16x16xf32>, vector<16x16xf32>, vector<16x16xf32> -> vector<16x16xf32>
    %22 = vector.broadcast %15 : vector<1x16xf32> to vector<16x16xf32>
    %23 = arith.addf %21, %22 : vector<16x16xf32>
    %cst_17 = arith.constant 0.000000e+00 : f32
    %24 = vector.broadcast %cst_17 : f32 to vector<16x112xf32>
    %25 = tpu.concatenate %23, %24 in 1 : vector<16x16xf32>, vector<16x112xf32> -> vector<16x128xf32>
    %c0_18 = arith.constant 0 : index
    %c0_19 = arith.constant 0 : index
    %26 = vector.load %arg6[%c0_18, %c0_19] : memref<16x128xf32, #tpu.memory_space<vmem>>, vector<16x128xf32>
    tpu.vector_store %arg6[%c0_18, %c0_19], %25 {strides = array<i32>} : memref<16x128xf32, #tpu.memory_space<vmem>>, vector<16x128xf32>,
    return
  }
}

</mosaic_0001>

<bundles_post_ra>
// kernel: forward.1
= control target key start
LH: loop header
LB: loop body
LE: loop exit
PB: predicated region body
PF: predicated region fallthrough
CT: control target
= control target key end

     0   :  { %vm29_vm0 = vcmask 130048   ;;  %vm111_vm1 = vcmask 64512   ;;  %s655_s30 = smov 120   ;;  %s656_s13 = smov 32   ;;  %vm284_vm2 = vcmask 261120   ;;  %s759_s1 = inlined_call_operand.vmem [shape: f32[16,16], index: 1, kind: input, shape index: {}]   ;;  %s760_s0 = inlined_call_operand.vmem [shape: f32[16,16], index: 0, kind: input, shape index: {}]   ;;  %s761_s2 = inlined_call_operand.vmem [shape: f32[8,32], index: 2, kind: input, shape index: {}]   ;;  %s762_s4 = inlined_call_operand.vmem [shape: f32[32,8], index: 4, kind: input, shape index: {}]   ;;  %s763_s3 = inlined_call_operand.vmem [shape: f32[1,64], index: 3, kind: input, shape index: {}]   ;;  %s764_s5 = inlined_call_operand.vmem [shape: f32[1,16], index: 5, kind: input, shape index: {}]   ;;  %s765_s6 = inlined_call_operand.vmem [shape: f32[16,128], index: 6, kind: output, shape index: {}]  }
   0x1   :  { %v26_v0 = vld [vmem:[%s759_s1 + $0x8] sm:$0xff]  ;;  %v25_v1 = vld [vmem:[%s759_s1] sm:$0xff]  ;;  %v300_v9 = vld [vmem:[%s762_s4 + $0x18] sm:$0xff] }
   0x2   :  { %v703_v2 = vld [vmem:[%s760_s0] sm:$0xff]  ;;  %605 = vmatprep.subr.mxu0 %v26_v0  ;;  %v710_v3 = vld [vmem:[%s760_s0 + $0x8] sm:$0xff]  ;;  %v299_v10 = vld [vmem:[%s762_s4 + $0x10] sm:$0xff] }
   0x3   :  { %609 = vmatprep.mubr.msk.f32.mxu0 %vm29_vm0, %v703_v2  ;;  %606 = vmatpush3.msra.mxu0 %v26_v0  ;;  %v27_v4 = vld [vmem:[%s761_s2] sm:$0xff]  ;;  %v298_v12 = vld [vmem:[%s762_s4 + $0x8] sm:$0xff] }
   0x4   :  { %607 = vmatprep.subr.mxu0 %v25_v1  ;;  %612 = vmatprep.subr.mxu1 %v27_v4  ;;  %v297_v13 = vld [vmem:[%s762_s4] sm:$0xff]  ;;  %s657_s4 = smov 96  }
   0x5   :  { %608 = vmatpush3.msra.mxu0 %v25_v1  ;;  %613 = vmatpush3.msra.mxu1 %v27_v4  ;;  %v571_v17 = vld [vmem:[%s763_s3] ss:$0 sm:$0xff]  ;;  %s658_s3 = smov 8  }
   0x6   :  { %610 = vmatmul.mubr.msk.f32.vlgmr.msra.gmra.mxu0 %vm29_vm0, %v710_v3  ;;  %617 = vmatprep.subr.mxu1 %v27_v4  ;;  %v576_v36 = vld [vmem:[%s764_s5] ss:$0 sm:$0xff] }
   0x7   :  { %622 = vmatprep.subr.mxu0 %v300_v9 }
   0x8   :  { %623 = vmatpush3.msra.mxu0 %v300_v9 }
   0x9   :  { %624 = vmatprep.subr.mxu0 %v299_v10 }
   0xa   :  { %625 = vmatpush3.msra.mxu0 %v299_v10 }
   0xb   :  { %626 = vmatprep.subr.mxu0 %v298_v12 }
   0xc   :  { %627 = vmatpush3.msra.mxu0 %v298_v12 }
   0xd   :  { %628 = vmatprep.subr.mxu0 %v297_v13 }
   0xe   :  { %629 = vmatpush3.msra.mxu0 %v297_v13 }
  0xc6   :  { %v611_v5 = vpop.f32.mrf.mxu0 }
  0xc8   :  { %v102_v6 = vpop.f32.mrf.mxu0 }
  0xc9   :  { %193 = vrot.lane.b32.xlu0 %v102_v6, %s655_s30  ;;  %614 = vmatprep.mubr.msk.f32.mxu1 %vm111_vm1, %v102_v6 }
  0xca   :  { %615 = vmatmul.mubr.msk.f32.vlgmr.msra.gmra.mxu1 %vm111_vm1, %v611_v5 }
  0xcb   :  { %618 = vmatpush3.msra.mxu1 %v27_v4 }
  0xcc   :  { %633 = vmatprep.subr.mxu1 %v300_v9 }
  0xcd   :  { %195 = vrot.lane.b32.xlu0 %v611_v5, %s655_s30 }
 0x13b   :  { %v194_v7 = vpop.permute.xlu0 %193 }
 0x13c   :  { %619 = vmatprep.mubr.msk.f32.mxu1 %vm111_vm1, %v194_v7 }
 0x13f   :  { %v196_v8 = vpop.permute.xlu0 %195 }
 0x140   :  { %620 = vmatmul.mubr.msk.f32.vlgmr.msra.gmra.mxu1 %vm111_vm1, %v196_v8 }
 0x141   :  { %634 = vmatpush3.msra.mxu1 %v300_v9 }
 0x142   :  { %635 = vmatprep.subr.mxu1 %v299_v10 }
 0x143   :  { %636 = vmatpush3.msra.mxu1 %v299_v10 }
 0x144   :  { %637 = vmatprep.subr.mxu1 %v298_v12 }
 0x145   :  { %638 = vmatpush3.msra.mxu1 %v298_v12 }
 0x146   :  { %639 = vmatprep.subr.mxu1 %v297_v13 }
 0x147   :  { %640 = vmatpush3.msra.mxu1 %v297_v13 }
 0x18a   :  { %v616_v11 = vpop.f32.mrf.mxu1 }
 0x18c   :  { %v184_v14 = vpop.f32.mrf.mxu1 }
 0x200   :  { %v621_v15 = vpop.f32.mrf.mxu1 }
 0x202   :  { %v267_v16 = vpop.f32.mrf.mxu1 }
 0x203   :  { %278 = vrot.lane.b32.xlu1 %v267_v16, %s656_s13 }
 0x207   :  { %280 = vrot.lane.b32.xlu1 %v621_v15, %s656_s13 }
 0x275   :  { %v279_v18 = vpop.permute.xlu1 %278 }
 0x276   :  { %v285_v19 = vsel %vm284_vm2, %v184_v14, %v279_v18 }
 0x277   :  { %v293_v20 = vadd.f32 %v571_v17, %v285_v19 }
 0x279   :  { %v295_v21 = vmax.f32 %v293_v20, 0.0  ;;  %v281_v22 = vpop.permute.xlu1 %280 }
 0x27a   :  { %v286_v23 = vsel %vm284_vm2, %v616_v11, %v281_v22 }
 0x27b   :  { %v294_v24 = vadd.f32 %v571_v17, %v286_v23  ;;  %383 = vrot.lane.b32.xlu0 %v295_v21, %s657_s4  ;;  %630 = vmatprep.mubr.msk.f32.mxu0 %vm284_vm2, %v295_v21 }
 0x27d   :  { %v296_v25 = vmax.f32 %v294_v24, 0.0 }
 0x27f   :  { %385 = vrot.lane.b32.xlu1 %v296_v25, %s657_s4  ;;  %631 = vmatmul.mubr.msk.f32.vlgmr.msra.gmra.mxu0 %vm284_vm2, %v296_v25 }
 0x280   :  { %648 = vmatprep.mubr.msk.f32.mxu0 %vm29_vm0, %v703_v2 }
 0x2ed   :  { %v384_v26 = vpop.permute.xlu0 %383 }
 0x2ee   :  { %641 = vmatprep.mubr.msk.f32.mxu1 %vm284_vm2, %v384_v26 }
 0x2f1   :  { %v386_v27 = vpop.permute.xlu1 %385 }
 0x2f2   :  { %642 = vmatmul.mubr.msk.f32.vlgmr.msra.gmra.mxu1 %vm284_vm2, %v386_v27 }
 0x33f   :  { %v632_v30 = vpop.f32.mrf.mxu0 }
 0x341   :  { %v374_v33 = vpop.f32.mrf.mxu0 }
 0x3b2   :  { %v643_v28 = vpop.f32.mrf.mxu1 }
 0x3b3   :  { %470 = vrot.lane.b32.xlu0 %v643_v28, %s658_s3 }
 0x3b4   :  { %v457_v29 = vpop.f32.mrf.mxu1 }
 0x3b5   :  { %468 = vrot.lane.b32.xlu1 %v457_v29, %s658_s3 }
 0x425   :  { %v471_v31 = vpop.permute.xlu0 %470 }
 0x426   :  { %v475_v32 = vsel %vm111_vm1, %v632_v30, %v471_v31 }
 0x427   :  { %v469_v34 = vpop.permute.xlu1 %468  ;;  %644 = vmatprep.subr.mxu0 %v475_v32 }
 0x428   :  { %645 = vmatpush3.msra.mxu0 %v475_v32  ;;  %v474_v35 = vsel %vm111_vm1, %v374_v33, %v469_v34 }
 0x429   :  { %646 = vmatprep.subr.mxu0 %v474_v35 }
 0x42a   :  { %647 = vmatpush3.msra.mxu0 %v474_v35 }
 0x42b   :  { %649 = vmatmul.mubr.msk.f32.vlgmr.msra.gmra.mxu0 %vm29_vm0, %v710_v3 }
 0x4eb   :  { %v650_v37 = vpop.f32.mrf.mxu0 }
 0x4ec   :  { %v554_v38 = vadd.f32 %v650_v37, %v576_v36 }
 0x4ed   :  { %v548_v39 = vpop.f32.mrf.mxu0 }
 0x4ee   :  { %v558_v40 = vsel %vm29_vm0, %v554_v38, 0.0  ;;  %v549_v41 = vadd.f32 %v576_v36, %v548_v39 }
 0x4ef   :  { %560 = vst [vmem:[%s765_s6 + $0x8] sm:$0xff] %v558_v40 }
 0x4f0   :  { %v557_v42 = vsel %vm29_vm0, %v549_v41, 0.0 }
 0x4f1   :  { %559 = vst [vmem:[%s765_s6] sm:$0xff] %v557_v42 }

</bundles_post_ra>
